<compile_context>
chip_gen: v7x
topology: tpu7x:2x2x1
jax: 0.10.0
libtpu: 0.0.40
codegen_flags: <defaults>
</compile_context>

<pallas_src>
from functools import partial

import jax
import jax.numpy as jnp
from jax import lax
from jax.experimental import pallas as pl
from jax.experimental.pallas import tpu as pltpu


# ----------------------------- Pallas kernels ------------------------------

def _conv_tap_kernel(*refs, k, W, HW, act, has_residual):
    """One output depth-plane of a stride-1 'same' 3D conv ("tap" path).

    Grid = (N, D_out, k).  The last grid axis is the depth tap k_d (reduction);
    for each k_d this kernel accumulates the k height taps:
        acc[(h,w), co] += sum_kh  xu[d+kd, (kh+h)*W + w, :] @ Wt[kd, kh]
    where the W (width) taps were pre-unfolded into the last (lane) dim.
    Epilogue (at kd == k-1): per-channel scale/shift (bias + eval BN), activation,
    optional residual add, cast to bf16.
    """
    if has_residual:
        xu_ref, w_ref, scale_ref, shift_ref, res_ref, o_ref, acc_ref = refs
    else:
        xu_ref, w_ref, scale_ref, shift_ref, o_ref, acc_ref = refs
        res_ref = None

    kd = pl.program_id(2)

    @pl.when(kd == 0)
    def _init():
        acc_ref[...] = jnp.zeros_like(acc_ref)

    contrib = jnp.dot(xu_ref[0, 0, 0:HW, :], w_ref[0, 0],
                      preferred_element_type=jnp.float32)
    for kh in range(1, k):
        contrib += jnp.dot(xu_ref[0, 0, kh * W:kh * W + HW, :], w_ref[0, kh],
                           preferred_element_type=jnp.float32)
    acc_ref[...] += contrib

    @pl.when(kd == k - 1)
    def _finalize():
        y = acc_ref[...] * scale_ref[...] + shift_ref[...]
        if act == "relu":
            y = jnp.maximum(y, 0.0)
        elif act == "tanh":
            y = jnp.tanh(y)
        if res_ref is not None:
            y = y + res_ref[0, 0].astype(jnp.float32)
        o_ref[0, 0] = y.astype(o_ref.dtype)


def _conv_band_kernel(x_ref, w_ref, scale_ref, shift_ref, o_ref, acc_ref,
                      *, k, H, n_wt, act):
    """Banded ("width-lifted") stride-1 conv for the large small-channel layers.

    Grid = (N, D_out, k); the last axis is the depth tap k_d (reduction).
      x_ref:   (1, 1, n_wt, H_in, Wh*Cin)  haloed width tiles of one input depth plane
      w_ref:   (k*k, Wh*Cin, Wt*Cout)      block-banded weights for all (kd, kh) taps,
                                           resident in VMEM for the whole call
      acc_ref: (n_wt, H, Wt*Cout) f32      accumulator across k_d
      o_ref:   (1, 1, n_wt, H, Wt*Cout)
    For each width tile t and each height tap kh, a single GEMM
        (H, Wh*Cin) @ (Wh*Cin, Wt*Cout)
    produces a whole (H, Wt*Cout) output slab (the k width taps live inside the
    banded weight), giving dense use of the MXU N dimension.
    """
    kd = pl.program_id(2)

    @pl.when(kd == 0)
    def _init():
        acc_ref[...] = jnp.zeros_like(acc_ref)

    for t in range(n_wt):
        contrib = None
        for kh in range(k):
            part = jnp.dot(x_ref[0, 0, t, kh:kh + H, :], w_ref[kd * k + kh],
                           preferred_element_type=jnp.float32)
            contrib = part if contrib is None else contrib + part
        acc_ref[t] += contrib

    @pl.when(kd == k - 1)
    def _finalize():
        for t in range(n_wt):
            y = acc_ref[t] * scale_ref[...] + shift_ref[...]
            if act == "relu":
                y = jnp.maximum(y, 0.0)
            elif act == "tanh":
                y = jnp.tanh(y)
            o_ref[0, 0, t] = y.astype(o_ref.dtype)


def _grad_mlp_kernel(g_ref, *refs):
    """All six grad_mapping Linear layers fused into one kernel (no activations)."""
    o_ref = refs[-1]
    wb = refs[:-1]
    h = g_ref[...].astype(jnp.float32)
    for i in range(0, len(wb), 2):
        h = jnp.dot(h, wb[i][...], preferred_element_type=jnp.float32) + wb[i + 1][...]
    o_ref[...] = h


# ------------------------------ layer wrappers ------------------------------

def _fold_bn(b, bn, Cout):
    """Fold conv bias + inference-mode BatchNorm into per-channel scale/shift.

    TODO(synk): train-mode BatchNorm (batch statistics) is not implemented; eval-mode
                running statistics are folded here instead.
    """
    if bn is None:
        scale = jnp.ones((Cout,), jnp.float32)
        shift = b.astype(jnp.float32)
    else:
        gamma, beta, mean, var = bn
        s = gamma / jnp.sqrt(var + 1e-5)
        scale = s
        shift = (b - mean) * s + beta
    return scale.astype(jnp.float32), shift.astype(jnp.float32)


def _banded_plan(W, H, Cin, Cout, k):
    """Pick a width tile Wt for the banded path, or None -> use the tap path.

    Banded only pays off when the tap path's GEMMs are badly underfilled
    (k*Cin small) and the spatial extent is large; the constraints also keep the
    resident banded weight <= ~4.5 MiB so no vmem_limit override is needed.
    """
    if k * Cin > 256 or W < 16 or H % 8 != 0:
        return None
    p = (k - 1) // 2
    for tw in range(W, 0, -1):
        if W % tw:
            continue
        kdim = (tw + 2 * p) * Cin          # GEMM K
        ndim = tw * Cout                    # GEMM N
        if kdim > 576 or ndim > 256:
            continue
        lane_pad_n = ((ndim + 127) // 128) * 128
        wbytes = k * k * kdim * lane_pad_n * 2   # bf16, lane-padded
        if wbytes > (9 << 19):              # ~4.5 MiB resident-weight cap
            continue
        return tw
    return None


def _conv_tap(x, w, scale, shift, *, act, residual):
    """Tap path: kw pre-unfolded (lane-dense), kh unrolled GEMMs, kd grid reduction."""
    N, D, H, W, C = x.shape
    Cout, k = w.shape[0], w.shape[2]
    p = (k - 1) // 2
    scale = scale.reshape(1, Cout)
    shift = shift.reshape(1, Cout)

    # Zero-pad spatial dims; unfold only the k width taps, then flatten (Hp, W) rows
    # so height taps are contiguous row ranges.
    xp = jnp.pad(x.astype(jnp.bfloat16),
                 ((0, 0), (p, p), (p, p), (p, p), (0, 0)))
    Dp, Hp = D + 2 * p, H + 2 * p
    xu = jnp.stack([xp[:, :, :, j:j + W, :] for j in range(k)], axis=4)
    xu = xu.reshape(N, Dp, Hp * W, k * C)                       # (N, Dp, Hp*W, k*C)

    # (Cout, Cin, kd, kh, kw) -> (kd, kh, kw*Cin, Cout) to match the unfold order.
    wk = jnp.transpose(w, (2, 3, 4, 1, 0)).reshape(k, k, k * C, Cout)
    wk = wk.astype(jnp.bfloat16)

    HW = H * W
    args = [xu, wk, scale, shift]
    in_specs = [
        pl.BlockSpec((1, 1, Hp * W, k * C), lambda n, d, kd: (n, d + kd, 0, 0)),
        pl.BlockSpec((1, k, k * C, Cout), lambda n, d, kd: (kd, 0, 0, 0)),
        pl.BlockSpec((1, Cout), lambda n, d, kd: (0, 0)),
        pl.BlockSpec((1, Cout), lambda n, d, kd: (0, 0)),
    ]
    if residual is not None:
        args.append(residual.reshape(N, D, HW, Cout).astype(jnp.bfloat16))
        in_specs.append(pl.BlockSpec((1, 1, HW, Cout), lambda n, d, kd: (n, d, 0, 0)))

    kernel = partial(_conv_tap_kernel, k=k, W=W, HW=HW, act=act,
                     has_residual=residual is not None)

    out = pl.pallas_call(
        kernel,
        out_shape=jax.ShapeDtypeStruct((N, D, HW, Cout), jnp.bfloat16),
        grid=(N, D, k),
        in_specs=in_specs,
        out_specs=pl.BlockSpec((1, 1, HW, Cout), lambda n, d, kd: (n, d, 0, 0)),
        scratch_shapes=[pltpu.VMEM((HW, Cout), jnp.float32)],
        compiler_params=pltpu.CompilerParams(
            dimension_semantics=("parallel", "parallel", "arbitrary")),
    )(*args)
    return out.reshape(N, D, H, W, Cout)


def _conv_band(x, w, scale, shift, *, act, tw):
    """Banded path: width taps lifted into a block-banded weight (dense MXU N dim)."""
    N, D, H, W, C = x.shape
    Cout, Cin, k = w.shape[0], w.shape[1], w.shape[2]
    p = (k - 1) // 2
    n_wt = W // tw
    twh = tw + 2 * p                                            # haloed tile width

    # Haloed width tiles of the zero-padded input: (N, D_in, n_wt, H_in, twh*C) bf16.
    xp = jnp.pad(x.astype(jnp.bfloat16),
                 ((0, 0), (p, p), (p, p), (p, p), (0, 0)))
    Din, Hin = D + 2 * p, H + 2 * p
    if n_wt == 1:
        xt = xp.reshape(N, Din, 1, Hin, twh * C)
    else:
        xt = jnp.stack([xp[:, :, :, t * tw:t * tw + twh, :] for t in range(n_wt)],
                       axis=2)
        xt = xt.reshape(N, Din, n_wt, Hin, twh * C)

    # Block-banded weight: band[kd*k+kh, (w_in,ci), (w_out,co)]
    #   = w[co, ci, kd, kh, w_in - w_out]  when 0 <= w_in - w_out < k, else 0.
    wt5 = jnp.transpose(w, (2, 3, 4, 1, 0)).astype(jnp.float32)  # (kd,kh,kw,ci,co)
    off = jnp.arange(twh)[:, None] - jnp.arange(tw)[None, :]     # (twh, tw)
    mask = (off >= 0) & (off < k)
    offc = jnp.clip(off, 0, k - 1)
    band = wt5[:, :, offc]                                       # (k,k,twh,tw,Cin,Cout)
    band = jnp.where(mask[None, None, :, :, None, None], band, 0.0)
    band = band.transpose(0, 1, 2, 4, 3, 5)                      # (k,k,twh,Cin,tw,Cout)
    band = band.reshape(k * k, twh * Cin, tw * Cout).astype(jnp.bfloat16)

    scale_t = jnp.tile(scale, (tw,)).reshape(1, tw * Cout)
    shift_t = jnp.tile(shift, (tw,)).reshape(1, tw * Cout)

    kernel = partial(_conv_band_kernel, k=k, H=H, n_wt=n_wt, act=act)

    out = pl.pallas_call(
        kernel,
        out_shape=jax.ShapeDtypeStruct((N, D, n_wt, H, tw * Cout), jnp.bfloat16),
        grid=(N, D, k),
        in_specs=[
            pl.BlockSpec((1, 1, n_wt, Hin, twh * C),
                         lambda n, d, kd: (n, d + kd, 0, 0, 0)),
            pl.BlockSpec((k * k, twh * Cin, tw * Cout),
                         lambda n, d, kd: (0, 0, 0)),
            pl.BlockSpec((1, tw * Cout), lambda n, d, kd: (0, 0)),
            pl.BlockSpec((1, tw * Cout), lambda n, d, kd: (0, 0)),
        ],
        out_specs=pl.BlockSpec((1, 1, n_wt, H, tw * Cout),
                               lambda n, d, kd: (n, d, 0, 0, 0)),
        scratch_shapes=[pltpu.VMEM((n_wt, H, tw * Cout), jnp.float32)],
        compiler_params=pltpu.CompilerParams(
            dimension_semantics=("parallel", "parallel", "arbitrary")),
    )(xt, band, scale_t, shift_t)

    out = out.reshape(N, D, n_wt, H, tw, Cout)
    out = jnp.transpose(out, (0, 1, 3, 2, 4, 5)).reshape(N, D, H, W, Cout)
    return out


def conv3d_same(x, w, b, *, bn=None, act="none", residual=None):
    """Stride-1, zero-padded 'same' 3D conv (+ folded eval-BN + activation + residual).

    x: (N, D, H, W, C) channels-last.  w: (Cout, Cin, k, k, k) (PyTorch layout).
    b: (Cout,).  bn: optional (gamma, beta, running_mean, running_var).
    residual: optional (N, D, H, W, Cout) added after the (none) activation.
    Returns (N, D, H, W, Cout) bf16.
    """
    N, D, H, W, C = x.shape
    Cout, Cin, k = w.shape[0], w.shape[1], w.shape[2]
    assert Cin == C and w.shape[3] == k and w.shape[4] == k
    scale, shift = _fold_bn(b, bn, Cout)

    tw = None
    if residual is None:
        tw = _banded_plan(W, H, Cin, Cout, k)
    if tw is None:
        return _conv_tap(x, w, scale, shift, act=act, residual=residual)
    return _conv_band(x, w, scale, shift, act=act, tw=tw)


def grad_mapping(mlp_params, g):
    """gradient -> 6 x Linear (fused in a single pallas_call).  g: (B, 4) f32."""
    args = [g.astype(jnp.float32)]
    for w, b in mlp_params:
        args.append(jnp.transpose(w).astype(jnp.float32))    # (in, out)
        args.append(b.reshape(1, -1).astype(jnp.float32))
    out_dim = mlp_params[-1][0].shape[0]
    return pl.pallas_call(
        _grad_mlp_kernel,
        out_shape=jax.ShapeDtypeStruct((g.shape[0], out_dim), jnp.float32),
    )(*args)


def upsample_nearest_2x(x):
    """nn.Upsample(scale_factor=2, mode='nearest') for (N, D, H, W, C)."""
    N, D, H, W, C = x.shape
    x = jnp.broadcast_to(x[:, :, None, :, None, :, None, :],
                         (N, D, 2, H, 2, W, 2, C))
    return x.reshape(N, 2 * D, 2 * H, 2 * W, C)


# -------------------------------- Decoder -----------------------------------

def init_decoder_params(key):
    """Deterministic parameters matching the Decoder's layer shapes."""
    kit = iter(jax.random.split(key, 40))

    def dense(cin, cout):
        kw, kb = jax.random.split(next(kit))
        w = jax.random.normal(kw, (cout, cin), jnp.float32) / jnp.sqrt(cin)
        b = 0.01 * jax.random.normal(kb, (cout,), jnp.float32)
        return w, b

    def conv(cin, cout, k):
        kw, kb = jax.random.split(next(kit))
        fan = cin * k ** 3
        w = jax.random.normal(kw, (cout, cin, k, k, k), jnp.float32) * (2.0 / fan) ** 0.5
        b = 0.01 * jax.random.normal(kb, (cout,), jnp.float32)
        return w, b

    def bnorm(c):
        kg, kb2 = jax.random.split(next(kit))
        gamma = 1.0 + 0.05 * jax.random.normal(kg, (c,), jnp.float32)
        beta = 0.05 * jax.random.normal(kb2, (c,), jnp.float32)
        mean = jnp.zeros((c,), jnp.float32)
        var = jnp.ones((c,), jnp.float32)
        return gamma, beta, mean, var

    mlp, d = [], 4
    for _ in range(6):
        mlp.append(dense(d, 2 * d))
        d *= 2

    res, dim = [], 132
    for _ in range(2):
        res.append((conv(dim, dim, 3), conv(dim, dim, 3)))

    up = []
    for _ in range(4):
        w, b = conv(dim, dim // 2, 5)
        up.append((w, b, bnorm(dim // 2)))
        dim //= 2

    w, b = conv(dim, dim, 5)
    mid = (w, b, bnorm(dim))
    out = conv(dim, 1, 7)

    return {"mlp": mlp, "res": res, "up": up, "mid": mid, "out": out}


def decoder_forward(params, x_ncdhw, gradient):
    """x_ncdhw: (B, 128, 4, 4, 4) f32; gradient: (B, 4) f32 -> (B, 1, 64, 64, 64) f32."""
    B = x_ncdhw.shape[0]

    g = grad_mapping(params["mlp"], gradient)               # (B, 256) f32
    g = g.reshape(B, 4, 4, 4, 4)                            # (B, C=4, D, H, W)
    g = jnp.transpose(g, (0, 2, 3, 4, 1))                   # channels-last

    x = jnp.transpose(x_ncdhw, (0, 2, 3, 4, 1))             # (B, 4, 4, 4, 128)
    h = jnp.concatenate([x, g], axis=-1).astype(jnp.bfloat16)   # (B, 4, 4, 4, 132)

    # 2 x ResBlock(132): norm='none', activation='tanh' on the first conv.
    for (w1, b1), (w2, b2) in params["res"]:
        t = conv3d_same(h, w1, b1, act="tanh")
        h = conv3d_same(t, w2, b2, act="none", residual=h)

    # 4 x [Upsample(x2, nearest) ; Conv3dBlock(k=5, BN, ReLU)]
    for w, b, bn in params["up"]:
        h = upsample_nearest_2x(h)
        h = conv3d_same(h, w, b, bn=bn, act="relu")

    # Conv3dBlock(8 -> 8, k=5, BN, ReLU)
    w, b, bn = params["mid"]
    h = conv3d_same(h, w, b, bn=bn, act="relu")

    # Conv3dBlock(8 -> 1, k=7, norm='none', tanh)
    w, b = params["out"]
    h = conv3d_same(h, w, b, act="tanh")

    return jnp.transpose(h, (0, 4, 1, 2, 3)).astype(jnp.float32)   # back to NCDHW


# ------------------------------- self-check ----------------------------------

def _check_conv_against_xla():
    """Compare both conv paths with lax.conv on tiny shapes (like-for-like bf16)."""
    key = jax.random.PRNGKey(42)
    cases = [
        ((1, 4, 4, 4, 20), 24, 3),      # tap path (W < 16)
        ((1, 4, 8, 32, 16), 8, 5),      # banded path, two width tiles
    ]
    for shp, cout, k in cases:
        kx, kw, key = jax.random.split(key, 3)
        cin = shp[-1]
        x = jax.random.normal(kx, shp, jnp.float32)
        w = jax.random.normal(kw, (cout, cin, k, k, k), jnp.float32)
        w = w * (1.0 / (cin * k ** 3)) ** 0.5
        b = jnp.zeros((cout,), jnp.float32)

        got = jax.jit(lambda a, c, d: conv3d_same(a, c, d, act="none"))(x, w, b)
        got = got.astype(jnp.float32)

        xr = x.astype(jnp.bfloat16).astype(jnp.float32)
        wr = w.astype(jnp.bfloat16).astype(jnp.float32)
        p = (k - 1) // 2
        ref = lax.conv_general_dilated(
            xr, wr, window_strides=(1, 1, 1), padding=[(p, p)] * 3,
            dimension_numbers=("NDHWC", "OIDHW", "NDHWC"),
            precision=lax.Precision.HIGHEST)
        err = float(jnp.max(jnp.abs(got - ref)))
        assert err < 5e-2, f"conv self-check failed: shape={shp} k={k} err={err}"


# ---------------------------------- main -------------------------------------

if __name__ == "__main__":
    _check_conv_against_xla()

    key = jax.random.PRNGKey(0)
    kp, kx, kg = jax.random.split(key, 3)
    params = init_decoder_params(kp)

    # Shapes implied by the module: gradient (B, 4); x must be (B, 128, 4, 4, 4)
    # so cat([x, reshape(grad, (B,4,4,4,4))], dim=1) gives the 132-channel input.
    x = jax.random.normal(kx, (2, 128, 4, 4, 4), jnp.float32)
    gradient = jax.random.normal(kg, (2, 4), jnp.float32)

    fwd = jax.jit(decoder_forward)
    out = jax.block_until_ready(fwd(params, x, gradient))

    assert out.shape == (2, 1, 64, 64, 64), out.shape
    assert bool(jnp.all(jnp.isfinite(out)))
    print("KERNEL_OK")
</pallas_src>

<mosaic_0001>
module attributes {stable_mosaic.version = 11 : i64} {
  func.func @_conv_tap_kernel(%arg0: i32, %arg1: i32, %arg2: i32, %arg3: memref<1x1x24x60xbf16, #tpu.memory_space<vmem>>, %arg4: memref<1x3x60x24xbf16, #tpu.memory_space<vmem>>, %arg5: memref<1x24xf32, #tpu.memory_space<vmem>>, %arg6: memref<1x24xf32, #tpu.memory_space<vmem>>, %arg7: memref<1x1x16x24xbf16, #tpu.memory_space<vmem>>, %arg8: memref<16x24xf32, #tpu.memory_space<vmem>>) attributes {dimension_semantics = [#tpu.dimension_semantics<parallel>, #tpu.dimension_semantics<parallel>, #tpu.dimension_semantics<arbitrary>], iteration_bounds = array<i64: 1, 4, 3>, scalar_prefetch = 0 : i64, scratch_operands = 1 : i64, tpu.core_type = #tpu.core_type<tc>, window_params = [{transform_indices = @transform_0, window_bounds = array<i64: 1, 1, 24, 60>}, {transform_indices = @transform_1, window_bounds = array<i64: 1, 3, 60, 24>}, {pipeline_mode = #tpu.pipeline_mode<synchronous>, transform_indices = @transform_2, window_bounds = array<i64: 1, 24>}, {pipeline_mode = #tpu.pipeline_mode<synchronous>, transform_indices = @transform_3, window_bounds = array<i64: 1, 24>}, {transform_indices = @transform_4, window_bounds = array<i64: 1, 1, 16, 24>}]} {
    %c0_i32 = arith.constant 0 : i32
    %0 = arith.cmpi eq, %arg2, %c0_i32 : i32
    %1 = arith.extui %0 : i1 to i32
    %c0_i32_0 = arith.constant 0 : i32
    %2 = arith.cmpi ne, %1, %c0_i32_0 : i32
    scf.if %2 {
      %cst_27 = arith.constant 0.000000e+00 : f32
      %26 = vector.broadcast %cst_27 : f32 to vector<16x24xf32>
      %c0_28 = arith.constant 0 : index
      %c0_29 = arith.constant 0 : index
      %27 = vector.load %arg8[%c0_28, %c0_29] : memref<16x24xf32, #tpu.memory_space<vmem>>, vector<16x24xf32>
      tpu.vector_store %arg8[%c0_28, %c0_29], %26 {strides = array<i32>} : memref<16x24xf32, #tpu.memory_space<vmem>>, vector<16x24xf32>,
    } else {
    }
    %c0 = arith.constant 0 : index
    %c0_1 = arith.constant 0 : index
    %c0_2 = arith.constant 0 : index
    %c0_3 = arith.constant 0 : index
    %3 = vector.load %arg3[%c0, %c0_1, %c0_2, %c0_3] : memref<1x1x24x60xbf16, #tpu.memory_space<vmem>>, vector<1x1x16x60xbf16>
    %4 = vector.shape_cast %3 : vector<1x1x16x60xbf16> to vector<16x60xbf16>
    %c0_4 = arith.constant 0 : index
    %c0_5 = arith.constant 0 : index
    %c0_6 = arith.constant 0 : index
    %c0_7 = arith.constant 0 : index
    %5 = vector.load %arg4[%c0_4, %c0_5, %c0_6, %c0_7] : memref<1x3x60x24xbf16, #tpu.memory_space<vmem>>, vector<1x1x60x24xbf16>
    %6 = vector.shape_cast %5 : vector<1x1x60x24xbf16> to vector<60x24xbf16>
    %cst = arith.constant dense<0.000000e+00> : vector<16x24xf32>
    %7 = tpu.matmul %4, %6, %cst {dimension_numbers = #tpu.dot_dimension_numbers<[1], [0], [0], [1], [0, 0, 1, 1], [], []>} : vector<16x60xbf16>, vector<60x24xbf16>, vector<16x24xf32> -> vector<16x24xf32>
    %c0_8 = arith.constant 0 : index
    %c0_9 = arith.constant 0 : index
    %c4 = arith.constant 4 : index
    %c0_10 = arith.constant 0 : index
    %8 = vector.load %arg3[%c0_8, %c0_9, %c4, %c0_10] : memref<1x1x24x60xbf16, #tpu.memory_space<vmem>>, vector<1x1x16x60xbf16>
    %9 = vector.shape_cast %8 : vector<1x1x16x60xbf16> to vector<16x60xbf16>
    %c0_11 = arith.constant 0 : index
    %c1 = arith.constant 1 : index
    %c0_12 = arith.constant 0 : index
    %c0_13 = arith.constant 0 : index
    %10 = vector.load %arg4[%c0_11, %c1, %c0_12, %c0_13] : memref<1x3x60x24xbf16, #tpu.memory_space<vmem>>, vector<1x1x60x24xbf16>
    %11 = vector.shape_cast %10 : vector<1x1x60x24xbf16> to vector<60x24xbf16>
    %cst_14 = arith.constant dense<0.000000e+00> : vector<16x24xf32>
    %12 = tpu.matmul %9, %11, %cst_14 {dimension_numbers = #tpu.dot_dimension_numbers<[1], [0], [0], [1], [0, 0, 1, 1], [], []>} : vector<16x60xbf16>, vector<60x24xbf16>, vector<16x24xf32> -> vector<16x24xf32>
    %13 = arith.addf %7, %12 : vector<16x24xf32>
    %c0_15 = arith.constant 0 : index
    %c0_16 = arith.constant 0 : index
    %c8 = arith.constant 8 : index
    %c0_17 = arith.constant 0 : index
    %14 = vector.load %arg3[%c0_15, %c0_16, %c8, %c0_17] : memref<1x1x24x60xbf16, #tpu.memory_space<vmem>>, vector<1x1x16x60xbf16>
    %15 = vector.shape_cast %14 : vector<1x1x16x60xbf16> to vector<16x60xbf16>
    %c0_18 = arith.constant 0 : index
    %c2 = arith.constant 2 : index
    %c0_19 = arith.constant 0 : index
    %c0_20 = arith.constant 0 : index
    %16 = vector.load %arg4[%c0_18, %c2, %c0_19, %c0_20] : memref<1x3x60x24xbf16, #tpu.memory_space<vmem>>, vector<1x1x60x24xbf16>
    %17 = vector.shape_cast %16 : vector<1x1x60x24xbf16> to vector<60x24xbf16>
    %cst_21 = arith.constant dense<0.000000e+00> : vector<16x24xf32>
    %18 = tpu.matmul %15, %17, %cst_21 {dimension_numbers = #tpu.dot_dimension_numbers<[1], [0], [0], [1], [0, 0, 1, 1], [], []>} : vector<16x60xbf16>, vector<60x24xbf16>, vector<16x24xf32> -> vector<16x24xf32>
    %19 = arith.addf %13, %18 : vector<16x24xf32>
    %c0_22 = arith.constant 0 : index
    %c0_23 = arith.constant 0 : index
    %20 = vector.load %arg8[%c0_22, %c0_23] : memref<16x24xf32, #tpu.memory_space<vmem>>, vector<16x24xf32>
    %21 = arith.addf %20, %19 : vector<16x24xf32>
    %c0_24 = arith.constant 0 : index
    %c0_25 = arith.constant 0 : index
    %22 = vector.load %arg8[%c0_24, %c0_25] : memref<16x24xf32, #tpu.memory_space<vmem>>, vector<16x24xf32>
    tpu.vector_store %arg8[%c0_24, %c0_25], %21 {strides = array<i32>} : memref<16x24xf32, #tpu.memory_space<vmem>>, vector<16x24xf32>,
    %c2_i32 = arith.constant 2 : i32
    %23 = arith.cmpi eq, %arg2, %c2_i32 : i32
    %24 = arith.extui %23 : i1 to i32
    %c0_i32_26 = arith.constant 0 : i32
    %25 = arith.cmpi ne, %24, %c0_i32_26 : i32
    scf.if %25 {
      %c0_27 = arith.constant 0 : index
      %c0_28 = arith.constant 0 : index
      %26 = vector.load %arg8[%c0_27, %c0_28] : memref<16x24xf32, #tpu.memory_space<vmem>>, vector<16x24xf32>
      %c0_29 = arith.constant 0 : index
      %c0_30 = arith.constant 0 : index
      %27 = vector.load %arg5[%c0_29, %c0_30] : memref<1x24xf32, #tpu.memory_space<vmem>>, vector<1x24xf32>
      %28 = vector.broadcast %27 : vector<1x24xf32> to vector<16x24xf32>
      %29 = arith.mulf %26, %28 : vector<16x24xf32>
      %c0_31 = arith.constant 0 : index
      %c0_32 = arith.constant 0 : index
      %30 = vector.load %arg6[%c0_31, %c0_32] : memref<1x24xf32, #tpu.memory_space<vmem>>, vector<1x24xf32>
      %31 = vector.broadcast %30 : vector<1x24xf32> to vector<16x24xf32>
      %32 = arith.addf %29, %31 : vector<16x24xf32>
      %33 = arith.truncf %32 : vector<16x24xf32> to vector<16x24xbf16>
      %c0_33 = arith.constant 0 : index
      %c0_34 = arith.constant 0 : index
      %c0_35 = arith.constant 0 : index
      %c0_36 = arith.constant 0 : index
      %34 = vector.load %arg7[%c0_33, %c0_34, %c0_35, %c0_36] : memref<1x1x16x24xbf16, #tpu.memory_space<vmem>>, vector<1x1x16x24xbf16>
      %35 = vector.shape_cast %34 : vector<1x1x16x24xbf16> to vector<16x24xbf16>
      %36 = vector.shape_cast %33 : vector<16x24xbf16> to vector<1x1x16x24xbf16>
      tpu.vector_store %arg7[%c0_33, %c0_34, %c0_35, %c0_36], %36 {strides = array<i32>} : memref<1x1x16x24xbf16, #tpu.memory_space<vmem>>, vector<1x1x16x24xbf16>,
    } else {
    }
    return
  }
  func.func @transform_0(%arg0: i32, %arg1: i32, %arg2: i32) -> (i32, i32, i32, i32) {
    %0 = arith.addi %arg1, %arg2 : i32
    %c0_i32 = arith.constant 0 : i32
    %c0_i32_0 = arith.constant 0 : i32
    %c0_i32_1 = arith.constant 0 : i32
    return %arg0, %0, %c0_i32, %c0_i32_0 : i32, i32, i32, i32
  }
  func.func @transform_1(%arg0: i32, %arg1: i32, %arg2: i32) -> (i32, i32, i32, i32) {
    %c0_i32 = arith.constant 0 : i32
    %c0_i32_0 = arith.constant 0 : i32
    %c0_i32_1 = arith.constant 0 : i32
    %c0_i32_2 = arith.constant 0 : i32
    return %arg2, %c0_i32, %c0_i32_0, %c0_i32_1 : i32, i32, i32, i32
  }
  func.func @transform_2(%arg0: i32, %arg1: i32, %arg2: i32) -> (i32, i32) {
    %c0_i32 = arith.constant 0 : i32
    %c0_i32_0 = arith.constant 0 : i32
    %c0_i32_1 = arith.constant 0 : i32
    return %c0_i32, %c0_i32_0 : i32, i32
  }
  func.func @transform_3(%arg0: i32, %arg1: i32, %arg2: i32) -> (i32, i32) {
    %c0_i32 = arith.constant 0 : i32
    %c0_i32_0 = arith.constant 0 : i32
    %c0_i32_1 = arith.constant 0 : i32
    return %c0_i32, %c0_i32_0 : i32, i32
  }
  func.func @transform_4(%arg0: i32, %arg1: i32, %arg2: i32) -> (i32, i32, i32, i32) {
    %c0_i32 = arith.constant 0 : i32
    %c0_i32_0 = arith.constant 0 : i32
    %c0_i32_1 = arith.constant 0 : i32
    return %arg0, %arg1, %c0_i32, %c0_i32_0 : i32, i32, i32, i32
  }
}

</mosaic_0001>

<bundles_post_ra>
// kernel: _lambda_.1
= control target key start
LH: loop header
LB: loop body
LE: loop exit
PB: predicated region body
PF: predicated region fallthrough
CT: control target
= control target key end

     0   :  { %9 = vsyncpa [#allocation4], 0  ;;  %s1204_s0 = inlined_call_operand.vmem [shape: bf16[1,6,24,60], index: 0, kind: input, shape index: {}]   ;;  %s1205_s1 = inlined_call_operand.vmem [shape: bf16[3,3,60,24], index: 1, kind: input, shape index: {}]   ;;  %s1206_s2 = inlined_call_operand.vmem [shape: f32[1,24], index: 2, kind: input, shape index: {}]   ;;  %s1207_s3 = inlined_call_operand.vmem [shape: f32[1,24], index: 3, kind: input, shape index: {}]   ;;  %s1208_s4 = inlined_call_operand.hbm [shape: bf16[1,4,16,24], index: 4, kind: output, shape index: {}]  }
   0x1   :  { %11 = vsyncpa [#allocation4 + $0x1], 0  ;;  %s1016_s15 = smov 0   ;;  %s1018_s16 = smov 0  }
   0x2   :  { %s1020_s17 = smov 0   ;;  %s1022_s18 = smov 0  }
   0x3   :  { %s1024_s19 = smov 0   ;;  %s1026_s20 = smov 0  }
   0x4   :  { %s1028_s21 = smov 0   ;;  %s1030_s22 = smov 0  }
   0x5 LB: > { %s687_s23 = sadd.s32 4294967295, %s983_s22   ;;  %s688_s24 = sadd.s32 4294967294, %s983_s22   ;;  %s983_s22 = sphi %s1030_s22, %s17_s22   ;;  %s979_s21 = sphi %s1028_s21, %s1217_s21   ;;  %s975_s20 = sphi %s1026_s20, %s1216_s20   ;;  %s971_s19 = sphi %s1024_s19, %s1215_s19   ;;  %s967_s18 = sphi %s1022_s18, %s1214_s18   ;;  %s963_s17 = sphi %s1020_s17, %s1213_s17   ;;  %s959_s16 = sphi %s1018_s16, %s1212_s16   ;;  %s955_s15 = sphi %s1016_s15, %s1211_s15  }
   0x6   : > { %s29_s25 = sadd.s32 1, %s975_s20  ;;  %s32_s26 = sadd.s32 1, %s979_s21 }
   0x7   : > { %p30_p0 = scmp.ge.s32.totalorder %s29_s25, 3  ;;  %p153_p1 = scmp.ne.s32.totalorder %s963_s17, %s959_s16 }
   0x8   : > { %p154_p2 = scmp.eq.s32.totalorder %s687_s23, 11  ;;  %p159_p4 = scmp.ne.s32.totalorder %s959_s16, %s955_s15 }
   0x9   : > { %s1219_s25 = smov (%p30_p0, %s29_s25), 0  ;;  %s1221_s26 = smov (!%p30_p0, %s32_s26), %s979_s21 }
   0xa   : > { %p1065_p3 = por %p154_p2, %p153_p1  ;;  %p34_p5 = scmp.ge.s32.totalorder %s1221_s26, 4 }
   0xb   : > { %p160_p6 = scmp.eq.s32.totalorder %s688_s24, 11  ;;  %p691_p7 = scmp.ge.s32.totalorder %s983_s22, 1 }
   0xc   : > { %p206_p8 = scmp.lt.s32.totalorder %s983_s22, 13  ;;  %s1223_s26 = smov (%p34_p5, %s1221_s26), 0 }
   0xd   : > { %p1075_p9 = por %p160_p6, %p159_p4  ;;  %s139_s29 = ssub.s32 %s979_s21, %s1223_s26 }
   0xe   : > { %p207_p10 = pnand %p691_p7, %p206_p8  ;;  %s143_s30 = sadd.s32 1, %s963_s17 }
   0xf   : > { %p141_p11 = scmp.eq.s32.totalorder %s139_s29, 0  ;;  %s239_s6 = sand.u32 (!%p207_p10), 1, %s959_s16  }
  0x10   : > { %210 = sbr.rel (%p207_p10) target bundleno = 321 (0x141), region = 36  ;;  %s242_s7 = sadd.s32 (!%p207_p10), %s967_s18, %s971_s19 }
  0x11   : > { %s1083_s5 = scalar_select %p141_p11, %s963_s17, %s143_s30  }
  0x12   : > { %s692_s8 = sshll.u32 (!%p207_p10), %s239_s6, 3  ;;  %p245_p12 = scmp.lt.s32.totalorder (!%p207_p10), %s242_s7, 5 }
  0x13   : > { %p253_p13 = scmp.lt.s32.totalorder (!%p207_p10), %s967_s18, 2  ;;  %s1102_s30 = scalar_lea.vmem (!%p207_p10), [#allocation3], %s692_s8 }
  0x14   : > { %p695_p0 = scmp.ne.s32.totalorder (!%p207_p10), %s967_s18, 0 }
  0x17   : > { %s1225_s7 = smov (!%p245_p12, %s242_s7), 5  ;;  %262 = sbr.rel (%p695_p0) target bundleno = 30 (0x1e), region = 40 }
  0x18   : > { %s254_s9 = scalar_select %p253_p13, %s967_s18, 2 }
  0x19   : > { %s795_s10 = smul.u32 12, %s1225_s7  ;;  %vm263_vm0 = vcmask (!%p695_p0), 195584   ;;  %v985_v0 = vmov (!%p695_p0), 0.0  }
  0x1a   : > { %s796_s11 = smul.u32 96, %s254_s9  ;;  %264 = vst.msk [vmem:[#allocation2] sm:$0xff] (!%p695_p0), %vm263_vm0, %v985_v0  ;;  %265 = vst.msk [vmem:[#allocation2 + $0x8] sm:$0xff] (!%p695_p0), %vm263_vm0, %v985_v0 }
  0x1b   : > { %s1095_s14 = scalar_lea.vmem %s1204_s0, %s795_s10 }
  0x1c   : > { %s1100_s29 = scalar_lea.vmem %s1205_s1, %s796_s11 }
  0x1e PF: > { %v873_v1 = vld [vmem:[%s1100_s29 + $0x20] sm:$0xff]   ;;  %v986_v2 = vmov 0.0   ;;  %v875_v4 = vld [vmem:[%s1100_s29 + $0x28] sm:$0xff]   ;;  %vm987_vm1 = vmmov 0   ;;  %v877_v6 = vld [vmem:[%s1100_s29 + $0x30] sm:$0xff]   ;;  %vm295_vm2 = vcmask 1045504  }
  0x1f   : > { %759 = vmatprep.subr.bf16.mxu0 %v986_v2  ;;  %771 = vmatprep.subr.bf16.mxu1 %v986_v2  ;;  %v874_v3 = vld [vmem:[%s1100_s29] sm:$0xff]   ;;  %v876_v5 = vld [vmem:[%s1100_s29 + $0x8] sm:$0xff]   ;;  %v879_v7 = vld [vmem:[%s1100_s29 + $0x38] sm:$0x3f]   ;;  %vm322_vm3 = vcmask 490496   ;;  %vm533_vm4 = vcmask 195584  }
  0x20   : > { %760 = vmatpush3.bf16.msra.mxu0 %v873_v1  ;;  %772 = vmatpush3.bf16.msra.mxu1 %v874_v3  ;;  %v878_v8 = vld [vmem:[%s1100_s29 + $0x10] sm:$0xff]   ;;  %v880_v9 = vld [vmem:[%s1100_s29 + $0x18] sm:$0x3f]   ;;  %v267_v10 = vld [vmem:[%s1095_s14 + $0x4] sm:$0xf]  ;;  %v328_v12 = vsel %vm295_vm2, %v879_v7, 0 }
  0x21   : > { %761 = vmatprep.subr.bf16.mxu0 %v986_v2  ;;  %773 = vmatprep.subr.bf16.mxu1 %v986_v2  ;;  %v276_v11 = vld [vmem:[%s1095_s14] sm:$0xc]  ;;  %v882_v14 = vld [vmem:[%s1095_s14 + $0x8] ss:$0 sps:$4 sm:$0x33]   ;;  %v401_v18 = vsel %vm295_vm2, %v880_v9, 0 }
  0x22   : > { %767 = vmatprep.mubr.msk.bf16.mxu0 %vm987_vm1, %v986_v2  ;;  %779 = vmatprep.mubr.msk.bf16.mxu1 %vm987_vm1, %v986_v2  ;;  %v704_v13 = vcombine.low %v276_v11, %v267_v10  ;;  %v266_v15 = vld [vmem:[%s1095_s14] sm:$0xf]  ;;  %v297_v17 = vrot.slane %v882_v14, 2  ;;  %v885_v22 = vld [vmem:[%s1100_s29 + $0x48] sm:$0xff]   ;;  %v886_v23 = vld [vmem:[%s1100_s29 + $0x50] sm:$0xff]   ;;  %p731_p1 = scmp.ne.s32.totalorder %s967_s18, 2 }
  0x23   : > { %v711_v20 = vcombine.low %v266_v15, %v267_v10  ;;  %v884_v21 = vld [vmem:[%s1100_s29 + $0x40] sm:$0xff]   ;;  %v887_v24 = vld [vmem:[%s1100_s29 + $0x58] sm:$0x3f]   ;;  %v444_v25 = vld [vmem:[%s1095_s14 + $0x8] sm:$0xf]  ;;  %vm568_vm5 = vcmask (!%p731_p1), 191488  }
  0x24   : > { %762 = vmatpush3.bf16.msra.mxu0 %v875_v4  ;;  %774 = vmatpush3.bf16.msra.mxu1 %v876_v5  ;;  %v296_v16 = vrot.slane %v704_v13, 2  ;;  %v484_v26 = vsel %vm295_vm2, %v887_v24, 0  ;;  %v725_v27 = vcombine.low %v267_v10, %v444_v25  ;;  %v529_v39 = vld [vmem:[#allocation2] sm:$0xff]  ;;  %v530_v43 = vld [vmem:[#allocation2 + $0x8] sm:$0xff] }
  0x25   : > { %763 = vmatprep.subr.bf16.mxu0 %v986_v2  ;;  %775 = vmatprep.subr.bf16.mxu1 %v986_v2  ;;  %v732_v49 = vld [vmem:[%s1206_s2] ss:$0 sm:$0xff] (!%p731_p1) }
  0x26   : > { %v298_v19 = vsel %vm295_vm2, %v296_v16, %v297_v17  ;;  %v733_v50 = vld [vmem:[%s1207_s3] ss:$0 sm:$0xff] (!%p731_p1) }
  0x28   : > { %764 = vmatpush3.bf16.msra.mxu0 %v877_v6  ;;  %776 = vmatpush3.bf16.msra.mxu1 %v878_v8 }
  0x29   : > { %765 = vmatprep.subr.bf16.mxu0 %v986_v2  ;;  %777 = vmatprep.subr.bf16.mxu1 %v986_v2 }
  0x2c   : > { %766 = vmatpush3.bf16.msra.mxu0 %v328_v12  ;;  %778 = vmatpush3.bf16.msra.mxu1 %v401_v18 }
  0x2d   : > { %783 = vmatprep.subr.bf16.mxu0 %v986_v2 }
  0x2f   : > { %768 = vmatmul.mubr.msk.bf16.vlgmr.msra.gmra.mrb[0].mxu0 %vm322_vm3, %v298_v19  ;;  %780 = vmatmul.mubr.msk.bf16.vlgmr.msra.gmra.mrb[0].mxu1 %vm322_vm3, %v711_v20 }
  0x30   : > { %784 = vmatpush3.bf16.msra.mxu0 %v884_v21  ;;  %791 = vmatprep.mubr.msk.bf16.mxu0 %vm987_vm1, %v986_v2 }
  0x31   : > { %785 = vmatprep.subr.bf16.mxu0 %v986_v2 }
  0x34   : > { %786 = vmatpush3.bf16.msra.mxu0 %v885_v22 }
  0x35   : > { %787 = vmatprep.subr.bf16.mxu0 %v986_v2 }
  0x38   : > { %788 = vmatpush3.bf16.msra.mxu0 %v886_v23 }
  0x39   : > { %789 = vmatprep.subr.bf16.mxu0 %v986_v2 }
  0x3c   : > { %790 = vmatpush3.bf16.msra.mxu0 %v484_v26 }
  0x3f   : > { %792 = vmatmul.mubr.msk.bf16.vlgmr.msra.gmra.mrb[4].mxu0 %vm322_vm3, %v725_v27 }
 0x102   : > { %v364_v28 = vpop.f32.mrb[0].mxu0  ;;  %v437_v29 = vpop.f32.mrb[0].mxu1 }
 0x103   : > { %v769_v30 = vpop.f32.mrb[1].mxu0  ;;  %v438_v31 = vadd.f32 %v437_v29, %v364_v28  ;;  %v781_v32 = vpop.f32.mrb[1].mxu1 }
 0x104   : > { %v367_v33 = vpop.f32.mrb[2].mxu0  ;;  %v440_v34 = vpop.f32.mrb[2].mxu1 }
 0x105   : > { %v770_v35 = vpop.f32.mrb[3].mxu0  ;;  %v441_v36 = vadd.f32 %v440_v34, %v367_v33  ;;  %v782_v37 = vpop.f32.mrb[3].mxu1 }
 0x112   : > { %v520_v38 = vpop.f32.mrb[4].mxu0 }
 0x113   : > { %v527_v40 = vadd.f32 %v520_v38, %v438_v31  ;;  %v793_v41 = vpop.f32.mrb[5].mxu0  ;;  %539 = sbr.rel (%p731_p1) target bundleno = 296 (0x128), region = 44 }
 0x114   : > { %v523_v42 = vpop.f32.mrb[6].mxu0 }
 0x115   : > { %v531_v44 = vadd.f32 %v529_v39, %v527_v40  ;;  %v528_v45 = vadd.f32 %v523_v42, %v441_v36  ;;  %v794_v46 = vpop.f32.mrb[7].mxu0 }
 0x117   : > { %534 = vst.msk [vmem:[#allocation2] sm:$0xff] %vm533_vm4, %v531_v44  ;;  %v532_v47 = vadd.f32 %v530_v43, %v528_v45 }
 0x119   : > { %535 = vst.msk [vmem:[#allocation2 + $0x8] sm:$0xff] %vm533_vm4, %v532_v47 }
 0x11e   : > { %v540_v48 = vld [vmem:[#allocation2] sm:$0xff] }
 0x11f   : > { %v549_v51 = vmul.f32 %v732_v49, %v540_v48 }
 0x120   : > { %v541_v52 = vld [vmem:[#allocation2 + $0x8] sm:$0xff] }
 0x121   : > { %v550_v53 = vmul.f32 %v732_v49, %v541_v52  ;;  %v558_v54 = vadd.f32 %v733_v50, %v549_v51 }
 0x123   : > { %v559_v55 = vadd.f32 %v733_v50, %v550_v53  ;;  %v741_v56 = vpack.c.bf16 %v558_v54, %v558_v54 }
 0x125   : > { %v742_v57 = vpack.c.bf16 %v559_v55, %v559_v55  ;;  %569 = vst.msk [vmem:[%s1102_s30] sm:$0xf] %vm568_vm5, %v741_v56 }
 0x127   : > { %570 = vst.msk [vmem:[%s1102_s30 + $0x4] sm:$0xf] %vm568_vm5, %v742_v57 }
 0x128 PF: > { %s743_s18 = sshll.u32 %s971_s19, 7  ;;  %s587_s14 = sshll.u32 %s1102_s30, 4  ;;  %s1148_s14 = int_to_ptr.vmem [resolvable:$true] %s587_s14 }
 0x129   : > { %s1145_s13 = scalar_lea.hbm %s1208_s4, %s743_s18  ;;  %s1152_s23 = scalar_lea.sflag [#allocation4], %s239_s6 }
 0x12a   : > { %s889_s24 = scalar_lea.vmem %s1148_s14, 128  ;;  %s988_s19 = smov [#allocation3]  }
 0x12b   : > { %p890_p2 = scmp.ne.s32.totalorder %s1148_s14, %s889_s24  ;;  %s893_s29 = sshll.u32 %s988_s19, 4  ;;  %s894_s29 = int_to_ptr.vmem [resolvable:$false] %s893_s29 }
 0x12c   : > { %s895_s7 = scalar_lea.vmem %s894_s29, 256  ;;  %p896_p6 = scmp.lt.s32.totalorder %s1148_s14, %s894_s29 }
 0x12d   : > { %p891_p4 = pnand %p890_p2, %p1065_p3  ;;  %p897_p7 = scmp.lt.s32.totalorder %s895_s7, %s889_s24 }
 0x12f   : > { %p892_p5 = pneg %p891_p4  ;;  %p898_p8 = por %p897_p7, %p896_p6 }
 0x131   : > { %p899_p10 = pnand %p898_p8, %p892_p5 }
 0x133   : > { %902 = shalt.err (!%p899_p10)
}
 0x134   : > { %s903_s6 = scalar_lea.hbm %s1145_s13, 128  ;;  %s907_s9 = scalar_lea.hbm %s1208_s4, 512 }
 0x135   : > { %p904_p11 = scmp.ne.s32.totalorder %s1145_s13, %s903_s6  ;;  %p908_p0 = scmp.lt.u32.totalorder %s1145_s13, %s1208_s4 }
 0x136   : > { %p909_p1 = scmp.lt.u32.totalorder %s907_s9, %s903_s6  ;;  %p911_p4 = scmp.lt.u32.totalorder %s903_s6, %s1145_s13 }
 0x137   : > { %p905_p12 = pnand %p904_p11, %p1065_p3 }
 0x138   : > { %p910_p2 = por %p909_p1, %p908_p0 }
 0x139   : > { %p906_p13 = pneg %p905_p12 }
 0x13a   : > { %p912_p5 = por %p911_p4, %p910_p2 }
 0x13c   : > { %p913_p6 = pnand %p912_p5, %p906_p13 }
 0x13e   : > { %916 = shalt.err (!%p913_p6)
}
 0x13f   : > { %s989_s11 = smov 64   ;;  %s990_s12 = smov 4  }
 0x140   : > { %797 = dma.vmem_to_hbm [thread:$0]  (%p1065_p3), %s1148_s14, 128, %s1145_s13, %s1152_s23, %s989_s11, %s989_s11, %s990_s12  }
 0x141 PF: > { %p803_p7 = scmp.ge.s32.totalorder %s983_s22, 2  ;;  %s602_s24 = sand.u32 1, %s955_s15  }
 0x142   : > { %s603_s19 = scalar_lea.sflag [#allocation4], %s602_s24 }
 0x143   : > { %p800_p8 = pnand %p803_p7, %p1075_p9 }
 0x145   : > { %950 = dma.done.wait (!%p800_p8), %s603_s19, 128  }
 0x146   : > { %952 = vsyncadd (!%p800_p8), %s603_s19, 4294967168  ;;  %s17_s22 = sadd.s32 1, %s983_s22   ;;  %s1211_s15 = smov %s959_s16 }
 0x147   : > { %p14_p10 = scmp.ge.s32.totalorder %s17_s22, 14   ;;  %s1212_s16 = smov %s963_s17 }
 0x148   : > { %s1213_s17 = smov %s1083_s5  ;;  %s1214_s18 = smov %s975_s20 }
 0x149   : > { %s1215_s19 = smov %s979_s21  ;;  %s1216_s20 = smov %s1219_s25 }
 0x14a   : > { %s1217_s21 = smov %s1223_s26  ;;  %16 = sbr.rel (!%p14_p10) target bundleno = 5 (0x5), region = 84 }
 0x151   :  { %608 = vsyncpa [#allocation4], 1 }
 0x152   :  { %610 = vsyncpa [#allocation4 + $0x1], 1 }

</bundles_post_ra>
